<compile_context>
chip_gen: v7x
topology: tpu7x:2x2x1
jax: 0.10.0
libtpu: 0.0.40
codegen_flags: <defaults>
</compile_context>

<pallas_src>
import jax
import jax.numpy as jnp
from jax.experimental import pallas as pl
from jax.experimental.pallas import tpu as pltpu

EPS = 1e-8


def _round_up(x, m):
    return ((x + m - 1) // m) * m


# ---------------------------------------------------------------------------
# Pallas kernel: per (spatial tile, batch)   out = v . x + c
# ---------------------------------------------------------------------------
def predictor_kernel(x_ref, v_ref, c_ref, out_ref):
    # x_ref  : (1, D, HW_TILE)  x.dtype  feature-map tile (channels x spatial)
    # v_ref  : (1, 1, D)        x.dtype  folded per-batch weight vector
    # c_ref  : (1,)             f32      folded scalar bias (SMEM)
    # out_ref: (1, 1, HW_TILE)  x.dtype
    acc = jax.lax.dot_general(
        v_ref[0], x_ref[0], (((1,), (0,)), ((), ())),
        preferred_element_type=jnp.float32)          # (1, HW_TILE), lane-dense
    out_ref[0] = (acc + c_ref[0]).astype(out_ref.dtype)


# ---------------------------------------------------------------------------
# Tiny per-batch weight folding (plain JAX, all on (D,D) matrices, D=32)
# ---------------------------------------------------------------------------
def _fold_weights(mod, kernel_mod, params):
    wada = params["adaptive_weights"]      # (L, N, D, D)  [out, in]
    wres = params["residual_w"]            # (D, D)        [out, in]
    bres = params["residual_b"]            # (D,)
    wlog = params["logits_w"]              # (1, D)
    blog = params["logits_b"]              # (1,)

    L, _, D, _ = wada.shape
    B = mod.shape[0]

    attn = jax.nn.softmax(kernel_mod.astype(jnp.float32), axis=-1)   # (B, N)
    mod1 = mod.astype(jnp.float32) + 1.0                             # (B, D)

    w_eff = jnp.broadcast_to(jnp.eye(D, dtype=jnp.float32), (B, D, D))
    for l in range(L):
        W = jnp.einsum("bn,noi->boi", attn, wada[l])                 # (B, D, D)
        W = W * mod1[:, None, :]                                     # modulate inputs
        inv = jax.lax.rsqrt(
            jnp.maximum(jnp.sum(W * W, axis=2, keepdims=True), EPS)) # demod
        W = W * inv
        w_eff = jnp.einsum("boi,bij->boj", W, w_eff)                 # compose chain

    w_total = w_eff + wres[None]                                     # (B, D, D)
    v = jnp.einsum("o,boi->bi", wlog[0], w_total)                    # (B, D)
    c = jnp.dot(wlog[0], bres) + blog[0]                             # scalar
    return v, c


# ---------------------------------------------------------------------------
# Wrapper
# ---------------------------------------------------------------------------
def predictor_forward(x_nchw, mod, kernel_mod, params, *, hw_tile=None):
    B, D, H, W = x_nchw.shape
    HW = H * W

    # Fold the whole network into one per-batch vector + scalar (exact: the
    # spec's Predictor has no activation between its 1x1 convs).
    v, c = _fold_weights(mod, kernel_mod, params)         # (B, D) f32, () f32

    # NCHW -> (B, D, HW): channels on sublanes, spatial on lanes.  Pure
    # dim-collapse reshape, no transpose, no copy.  x keeps its own dtype:
    # no wrapper-side cast/pad passes over HBM.
    x = x_nchw.reshape(B, D, HW)

    # Big lane-dense spatial tiles: ~0.35us per grid step, so amortize it.
    # f32 32K-lane tile = 4 MiB/buffer; double-buffered it fits comfortably in
    # scoped VMEM on v5e/v6e/v7x.
    if hw_tile is None:
        hw_tile = min(32768, _round_up(HW, 128))
    num_tiles = pl.cdiv(HW, hw_tile)

    v3 = v.reshape(B, 1, D).astype(x.dtype)
    c_arr = jnp.reshape(c, (1,)).astype(jnp.float32)

    out = pl.pallas_call(
        predictor_kernel,
        out_shape=jax.ShapeDtypeStruct((B, 1, HW), x.dtype),
        grid_spec=pltpu.PrefetchScalarGridSpec(
            num_scalar_prefetch=0,
            # Spatial tile axis first so megacore (v7x) splits the large
            # streaming axis; both axes parallel.
            grid=(num_tiles, B),
            in_specs=[
                pl.BlockSpec((1, D, hw_tile), lambda t, b: (b, 0, t)),
                pl.BlockSpec((1, 1, D), lambda t, b: (b, 0, 0)),
                pl.BlockSpec(memory_space=pltpu.MemorySpace.SMEM),
            ],
            # Output emitted at exact (B, 1, HW): ragged last tile handled by
            # Pallas' masked writeback -> no post-kernel slice copy.
            out_specs=pl.BlockSpec((1, 1, hw_tile), lambda t, b: (b, 0, t)),
        ),
        compiler_params=pltpu.CompilerParams(
            dimension_semantics=("parallel", "parallel"),
            vmem_limit_bytes=32 * 1024 * 1024),
    )(x, v3, c_arr)

    return out.reshape(B, 1, H, W)


# ---------------------------------------------------------------------------
# Pure-JAX reference mirroring the PyTorch forward (layer-by-layer, NCHW, f32)
# ---------------------------------------------------------------------------
def predictor_reference(x_nchw, mod, kernel_mod, params):
    wada = params["adaptive_weights"]
    wres = params["residual_w"]
    bres = params["residual_b"]
    wlog = params["logits_w"]
    blog = params["logits_b"]

    x = x_nchw
    residual = (jnp.einsum("oi,bihw->bohw", wres, x)
                + bres[None, :, None, None])
    attn = jax.nn.softmax(kernel_mod, axis=-1)               # (B, N)
    for l in range(wada.shape[0]):
        W = jnp.einsum("bn,noi->boi", attn, wada[l])          # (B, o, i)
        W = W * (mod + 1.0)[:, None, :]
        inv = jax.lax.rsqrt(
            jnp.maximum(jnp.sum(W * W, axis=2, keepdims=True), EPS))
        W = W * inv
        x = jnp.einsum("boi,bihw->bohw", W, x)
    x = x + residual
    return jnp.einsum("oi,bihw->bohw", wlog, x) + blog[None, :, None, None]


def init_params(key, dim, depth, num_conv_kernels):
    k = jax.random.split(key, 5)
    # AdaptiveConv2DMod weights: kaiming_normal fan_in, leaky_relu(a=0) gain
    std = (2.0 / dim) ** 0.5
    wada = jax.random.normal(
        k[0], (depth, num_conv_kernels, dim, dim), jnp.float32) * std
    wres = jax.random.normal(k[1], (dim, dim), jnp.float32) * (1.0 / dim) ** 0.5
    bres = jax.random.normal(k[2], (dim,), jnp.float32) * 0.01
    wlog = jax.random.normal(k[3], (1, dim), jnp.float32) * (1.0 / dim) ** 0.5
    blog = jax.random.normal(k[4], (1,), jnp.float32) * 0.01
    return dict(adaptive_weights=wada, residual_w=wres, residual_b=bres,
                logits_w=wlog, logits_b=blog)


if __name__ == "__main__":
    B, D, H, Wsp = 2, 32, 16, 16
    DEPTH, NKERN = 4, 2

    key = jax.random.PRNGKey(0)
    kx, km, kk, kp = jax.random.split(key, 4)

    x = jax.random.normal(kx, (B, D, H, Wsp), jnp.float32)        # NCHW like torch
    mod = jax.random.normal(km, (B, D), jnp.float32)
    kernel_mod = jax.random.normal(kk, (B, NKERN), jnp.float32)
    params = init_params(kp, D, DEPTH, NKERN)

    fwd = jax.jit(predictor_forward)
    out = jax.block_until_ready(fwd(x, mod, kernel_mod, params))
    ref = jax.block_until_ready(predictor_reference(x, mod, kernel_mod, params))

    assert out.shape == (B, 1, H, Wsp)
    max_err = float(jnp.max(jnp.abs(out - ref)))
    # Everything is f32 end-to-end now; only matmul reassociation differs.
    assert jnp.allclose(out, ref, rtol=1e-3, atol=1e-3), max_err

    print("KERNEL_OK")
</pallas_src>

<mosaic_0001>
module attributes {stable_mosaic.version = 11 : i64} {
  func.func @predictor_kernel(%arg0: i32, %arg1: i32, %arg2: memref<1x32x256xf32, #tpu.memory_space<vmem>>, %arg3: memref<1x1x32xf32, #tpu.memory_space<vmem>>, %arg4: memref<1xf32, #tpu.memory_space<smem>>, %arg5: memref<1x1x256xf32, #tpu.memory_space<vmem>>) attributes {dimension_semantics = [#tpu.dimension_semantics<parallel>, #tpu.dimension_semantics<parallel>], iteration_bounds = array<i64: 1, 2>, scalar_prefetch = 0 : i64, scratch_operands = 0 : i64, tpu.core_type = #tpu.core_type<tc>, window_params = [{transform_indices = @transform_0, window_bounds = array<i64: 1, 32, 256>}, {transform_indices = @transform_1, window_bounds = array<i64: 1, 1, 32>}, {transform_indices = @transform_2, window_bounds = array<i64: 1>}, {transform_indices = @transform_3, window_bounds = array<i64: 1, 1, 256>}]} {
    %c0 = arith.constant 0 : index
    %c0_0 = arith.constant 0 : index
    %c0_1 = arith.constant 0 : index
    %0 = vector.load %arg3[%c0, %c0_0, %c0_1] : memref<1x1x32xf32, #tpu.memory_space<vmem>>, vector<1x1x32xf32>
    %1 = vector.shape_cast %0 : vector<1x1x32xf32> to vector<1x32xf32>
    %c0_2 = arith.constant 0 : index
    %c0_3 = arith.constant 0 : index
    %c0_4 = arith.constant 0 : index
    %2 = vector.load %arg2[%c0_2, %c0_3, %c0_4] : memref<1x32x256xf32, #tpu.memory_space<vmem>>, vector<1x32x256xf32>
    %3 = vector.shape_cast %2 : vector<1x32x256xf32> to vector<32x256xf32>
    %cst = arith.constant dense<0.000000e+00> : vector<1x256xf32>
    %4 = tpu.matmul %1, %3, %cst {dimension_numbers = #tpu.dot_dimension_numbers<[1], [0], [0], [1], [0, 0, 1, 1], [], []>} : vector<1x32xf32>, vector<32x256xf32>, vector<1x256xf32> -> vector<1x256xf32>
    %c0_5 = arith.constant 0 : index
    %5 = memref.load %arg4[%c0_5] : memref<1xf32, #tpu.memory_space<smem>>
    %6 = vector.broadcast %5 : f32 to vector<1x256xf32>
    %7 = arith.addf %4, %6 : vector<1x256xf32>
    %c0_6 = arith.constant 0 : index
    %c0_7 = arith.constant 0 : index
    %c0_8 = arith.constant 0 : index
    %8 = vector.load %arg5[%c0_6, %c0_7, %c0_8] : memref<1x1x256xf32, #tpu.memory_space<vmem>>, vector<1x1x256xf32>
    %9 = vector.shape_cast %8 : vector<1x1x256xf32> to vector<1x256xf32>
    %10 = vector.shape_cast %7 : vector<1x256xf32> to vector<1x1x256xf32>
    tpu.vector_store %arg5[%c0_6, %c0_7, %c0_8], %10 {strides = array<i32>} : memref<1x1x256xf32, #tpu.memory_space<vmem>>, vector<1x1x256xf32>,
    return
  }
  func.func @transform_0(%arg0: i32, %arg1: i32) -> (i32, i32, i32) {
    %c0_i32 = arith.constant 0 : i32
    %c0_i32_0 = arith.constant 0 : i32
    return %arg1, %c0_i32, %arg0 : i32, i32, i32
  }
  func.func @transform_1(%arg0: i32, %arg1: i32) -> (i32, i32, i32) {
    %c0_i32 = arith.constant 0 : i32
    %c0_i32_0 = arith.constant 0 : i32
    %c0_i32_1 = arith.constant 0 : i32
    return %arg1, %c0_i32, %c0_i32_0 : i32, i32, i32
  }
  func.func @transform_2(%arg0: i32, %arg1: i32) -> i32 {
    %c0_i32 = arith.constant 0 : i32
    %c0_i32_0 = arith.constant 0 : i32
    return %c0_i32 : i32
  }
  func.func @transform_3(%arg0: i32, %arg1: i32) -> (i32, i32, i32) {
    %c0_i32 = arith.constant 0 : i32
    %c0_i32_0 = arith.constant 0 : i32
    return %arg1, %c0_i32, %arg0 : i32, i32, i32
  }
}

</mosaic_0001>

<bundles_post_ra>
// kernel: predictor_forward.1
= control target key start
LH: loop header
LB: loop body
LE: loop exit
PB: predicated region body
PF: predicated region fallthrough
CT: control target
= control target key end

     0   :  { %s517_s14 = smov 0   ;;  %s519_s15 = smov 0   ;;  %s558_s0 = inlined_call_operand.vmem [shape: f32[2,32,256], index: 0, kind: input, shape index: {}]   ;;  %s559_s1 = inlined_call_operand.vmem [shape: f32[2,1,32], index: 1, kind: input, shape index: {}]   ;;  %s560_s2 = inlined_call_operand.<no memory space> [shape: f32[1], index: 2, kind: input, shape index: {}]   ;;  %s561_s3 = inlined_call_operand.vmem [shape: f32[2,1,256], index: 3, kind: output, shape index: {}]  }
   0x1   :  { %8 = sst [smem:[#allocation2]] %s560_s2  ;;  %s521_s16 = smov 0  }
   0x2 LB: > { %s23_s2 = sadd.s32 1, %s486_s15  ;;  %p426_p0 = scmp.ge.s32.totalorder %s490_s16, 1  ;;  %s490_s16 = sphi %s521_s16, %s14_s16   ;;  %s486_s15 = sphi %s519_s15, %s563_s15   ;;  %s482_s14 = sphi %s517_s14, %s562_s14  }
   0x3   : > { %p24_p1 = scmp.ge.s32.totalorder %s23_s2, 2  ;;  %p167_p2 = scmp.lt.s32.totalorder %s490_s16, 3 }
   0x5   : > { %s565_s2 = smov (%p24_p1, %s23_s2), 0  ;;  %p168_p3 = pnand %p426_p0, %p167_p2 }
   0x6   : > { %p202_p4 = scmp.lt.s32.totalorder (!%p168_p3), %s482_s14, 1  ;;  %v492_v0 = vmov (!%p168_p3), 0.0   ;;  %vm234_vm0 = vcmask (!%p168_p3), 261120   ;;  %s232_s24 = sld [smem:[#allocation2]] (!%p168_p3)  ;;  %v493_v14 = vmov (!%p168_p3), 1966171168   ;;  %v315_v16 = vlaneseq (!%p168_p3) }
   0x7   : > { %171 = sbr.rel (%p168_p3) target bundleno = 250 (0xfa), region = 32  ;;  %302 = vmatprep.mubr.f32.mxu0 (!%p168_p3), %v492_v0  ;;  %v313_v15 = vunpack.c.l.s4 (!%p168_p3), %v493_v14 }
   0x8   : > { %v316_v19 = vshrl.u32 (!%p168_p3), %v315_v16, 7  ;;  %vm329_vm1 = vcmp.lt.s32.totalorder (!%p168_p3), %v315_v16, 256 }
   0x9   : > { %v314_v18 = vunpack.c.0.s8 (!%p168_p3), %v313_v15 }
   0xb   : > { %v317_v24 = vsub.s32 (!%p168_p3), %v314_v18, %v316_v19 }
   0xc   : > { %v233_v17 = vstv (!%p168_p3), %s232_s24 }
   0xe   : > { %s567_s14 = smov (!%p202_p4, %s482_s14), 1 }
   0xf   : > { %s433_s17 = sshll.u32 %s567_s14, 6  ;;  %s213_s23 = scalar_lea.vmem %s559_s1, %s567_s14 }
  0x10   : > { %s209_s20 = scalar_lea.vmem %s558_s0, %s433_s17  ;;  %v223_v13 = vld [vmem:[%s213_s23] sm:$0x1]  ;;  %s429_s25 = sshll.u32 %s567_s14, 1 }
  0x11   : > { %v225_v1 = vld [vmem:[%s209_s20 + $0x8] sm:$0xff]  ;;  %v227_v2 = vld [vmem:[%s209_s20 + $0x18] sm:$0xff]  ;;  %v224_v3 = vld [vmem:[%s209_s20] sm:$0xff]  ;;  %s221_s28 = scalar_lea.vmem %s561_s3, %s429_s25 }
  0x12   : > { %v434_v4 = vpack.c.bf16 %v227_v2, %v225_v1  ;;  %v226_v5 = vld [vmem:[%s209_s20 + $0x10] sm:$0xff]  ;;  %v229_v6 = vld [vmem:[%s209_s20 + $0x28] sm:$0xff]  ;;  %v231_v7 = vld [vmem:[%s209_s20 + $0x38] sm:$0xff] }
  0x13   : > { %v436_v8 = vpack.c.bf16 %v226_v5, %v224_v3  ;;  %v438_v9 = vpack.c.bf16 %v231_v7, %v229_v6  ;;  %v228_v10 = vld [vmem:[%s209_s20 + $0x20] sm:$0xff]  ;;  %v230_v11 = vld [vmem:[%s209_s20 + $0x30] sm:$0xff] }
  0x14   : > { %435 = vmatprep.subr.bf16.mxu0 %v434_v4  ;;  %v440_v12 = vpack.c.bf16 %v230_v11, %v228_v10 }
  0x15   : > { %437 = vmatpush1.bf16.msra.mxu0 %v436_v8 }
  0x16   : > { %439 = vmatprep.subr.bf16.mxu0 %v438_v9 }
  0x19   : > { %441 = vmatpush1.bf16.msra.mxu0 %v440_v12 }
  0x1c   : > { %430 = vmatmul.mubr.msk.f32.vlgmr.msra.gmra.mrb[0].mxu0 %vm234_vm0, %v223_v13 }
  0xef   : > { %v304_v20 = vpop.f32.mrb[0].mxu0 }
  0xf0   : > { %v305_v21 = vadd.f32 %v304_v20, %v233_v17  ;;  %v306_v22 = vpop.f32.mrb[1].mxu0 }
  0xf1   : > { %v307_v23 = vadd.f32 %v306_v22, %v233_v17 }
  0xf3   : > { %v311_v25 = vcombine.low %v305_v21, %v307_v23 }
  0xf5   : > { %v318_v26 = vrot.slane %v311_v25, %v317_v24 }
  0xf7   : > { %v325_v27 = vrot.slane %v318_v26, %v317_v24 }
  0xf9   : > { %331 = vst.msk [vmem:[%s221_s28] sm:$0x3] %vm329_vm1, %v325_v27 }
  0xfa PF: > { %s14_s16 = sadd.s32 1, %s490_s16   ;;  %s562_s14 = smov %s486_s15 }
  0xfb   : > { %p11_p5 = scmp.ge.s32.totalorder %s14_s16, 4   ;;  %s563_s15 = smov %s565_s2 }
  0xfd   :  { %13 = sbr.rel (!%p11_p5) target bundleno = 2 (0x2), region = 65 }

</bundles_post_ra>
